<compile_context>
chip_gen: v7x
topology: tpu7x:2x2x1
jax: 0.10.0
libtpu: 0.0.40
codegen_flags: <defaults>
</compile_context>

<pallas_src>
import functools

import jax
import jax.numpy as jnp
from jax.experimental import pallas as pl
from jax.experimental.pallas import tpu as pltpu


def _round_up(x, m):
    return ((x + m - 1) // m) * m


def _resident_spec(shape):
    """VMEM-resident operand (constant index_map); single-buffered when supported."""
    index_map = lambda b, s: (0,) * len(shape)
    try:
        return pl.BlockSpec(shape, index_map, pipeline_mode=pl.Buffered(buffer_count=1))
    except (TypeError, AttributeError):
        # Older jax without pipeline_mode / Buffered: fall back to default double-buffering.
        return pl.BlockSpec(shape, index_map)


def pool_project_kernel(h_ref, w1_ref, b1_ref, w2_ref, b2_ref,
                        pooled_ref, proj_ref, acc_ref, *,
                        true_seq_len, mask_ragged):
    """Grid = (batch_tiles, seq_tiles); seq axis (reduction) is innermost.

    Accumulates the sequence sum into an f32 VMEM scratch; the final seq step
    normalizes by the true sequence length and runs the projection head.
    """
    step = pl.program_id(1)
    tb, ts, d = h_ref.shape
    groups = acc_ref.shape[1]          # 8 when ts % 8 == 0, else 1 (tiny full-extent tile)

    @pl.when(step == 0)
    def _init():
        acc_ref[...] = jnp.zeros_like(acc_ref)

    h = h_ref[...].astype(jnp.float32)                       # accumulate in f32 (bf16-safe)

    if mask_ragged:
        # The last sequence block extends past the true S: those rows hold undefined data
        # (no wrapper-side pad), so zero them before accumulating.
        row = jax.lax.broadcasted_iota(jnp.int32, (ts, d), 0)
        limit = true_seq_len - step * ts
        h = jnp.where((row < limit)[None, :, :], h, 0.0)

    if groups == 8 and ts % 8 == 0:
        # Pure VPU vreg adds: fold the seq tile into 8 sublane rows; the single sublane
        # (XLU) reduce is deferred to the finalize step so the hot loop stays off the XLU.
        partial = h[:, 0:8, :]
        for g in range(1, ts // 8):
            partial = partial + h[:, g * 8:(g + 1) * 8, :]
    else:
        partial = jnp.sum(h, axis=1, keepdims=True)          # tiny (< 8 row) tile fallback
    acc_ref[...] += partial

    @pl.when(step == pl.num_programs(1) - 1)
    def _finalize():
        # Single sublane reduce + divide by the TRUE sequence length.
        pooled = acc_ref[...].sum(axis=1) * (1.0 / float(true_seq_len))   # (tb, D) f32
        pooled_ref[...] = pooled.astype(pooled_ref.dtype)

        # Projection head: feed the MXU in the weights' native dtype (bf16 stays bf16),
        # accumulate in f32, add biases in f32.
        h1 = jnp.dot(pooled.astype(w1_ref.dtype), w1_ref[...],
                     preferred_element_type=jnp.float32)
        h1 = jnp.maximum(h1 + b1_ref[...].astype(jnp.float32), 0.0)
        proj = jnp.dot(h1.astype(w2_ref.dtype), w2_ref[...],
                       preferred_element_type=jnp.float32)
        proj = proj + b2_ref[...].astype(jnp.float32)
        proj_ref[...] = proj.astype(proj_ref.dtype)


def audio_embedding_forward(hidden_states, w1, b1, w2, b2, *, seq_tile=512, batch_tile=None):
    """hidden_states: (B, S, D); w1: (D, D); b1: (1, D); w2: (D, P); b2: (1, P).

    nn.Linear weights are pre-transposed to (in, out) so the kernel computes x @ W + b.
    Returns (pooled, projection) like the PyTorch module.
    """
    B, S, D = hidden_states.shape
    P = w2.shape[1]
    assert w1.shape == (D, D) and b1.shape == (1, D)
    assert w2.shape == (D, P) and b2.shape == (1, P)

    # --- batch tile: split into >= 2 tiles when legal so the "parallel" axis shards across
    # v7x's two TensorCores (no effect on v5e/v6e, 1 TC/chip).
    if batch_tile is None:
        tb = B // 2 if (B % 16 == 0) else B
    else:
        tb = batch_tile
    assert B % tb == 0, "batch_tile must divide the batch"
    assert tb % 8 == 0 or tb == B, "batch tile must be a multiple of 8 (or the whole batch)"

    itemsize = jnp.dtype(hidden_states.dtype).itemsize
    # Sub-32-bit streams (bf16) pack 16 rows per vreg: keep the seq tile 16-row aligned.
    gran = 16 if itemsize < 4 else 8

    # --- seq tile: never larger than S (ragged last tile is masked in-kernel, no jnp.pad).
    ts_cap = (S // gran) * gran
    if ts_cap == 0:
        ts = S                      # tiny sequence: one full-extent block (exempt from 8-rule)
    else:
        ts = max(gran, min(_round_up(seq_tile, gran), ts_cap))

    # --- VMEM budget per generation (v7x: 64 MiB/TC -> ~48 MB ceiling; v5e/v6e: 128 MiB).
    try:
        vmem_cap = int(pltpu.get_tpu_info().vmem_capacity_bytes)
    except Exception:
        vmem_cap = 64 * 1024 * 1024            # conservative (v7x-sized) fallback
    vmem_ceiling = (vmem_cap * 3) // 4         # headroom for Mosaic internal scratch

    weight_bytes = sum(int(a.size) * jnp.dtype(a.dtype).itemsize for a in (w1, b1, w2, b2))
    acc_rows = 8 if ts % 8 == 0 else 1
    fixed_bytes = (weight_bytes                 # single-buffered resident weights
                   + tb * acc_rows * D * 4      # f32 accumulator scratch
                   + 2 * tb * (D + P) * 4       # double-buffered outputs (upper bound)
                   + (2 << 20))                 # margin
    # Shrink the streamed tile only if the double-buffered stream would bust the budget.
    while ts > gran and ts % gran == 0 and 2 * tb * ts * D * itemsize + fixed_bytes > vmem_ceiling:
        ts = max(gran, _round_up(ts // 2, gran))

    acc_rows = 8 if ts % 8 == 0 else 1
    grid = (B // tb, pl.cdiv(S, ts))
    need = 2 * tb * ts * D * itemsize + fixed_bytes
    vmem_limit = int(min(max(2 * need, 32 * 1024 * 1024), vmem_ceiling))

    pooled_dtype = hidden_states.dtype
    proj_dtype = jnp.result_type(hidden_states.dtype, w2.dtype)

    kernel = functools.partial(pool_project_kernel,
                               true_seq_len=S,
                               mask_ragged=(S % ts != 0))

    pooled, proj = pl.pallas_call(
        kernel,
        out_shape=(
            jax.ShapeDtypeStruct((B, D), pooled_dtype),
            jax.ShapeDtypeStruct((B, P), proj_dtype),
        ),
        grid_spec=pltpu.PrefetchScalarGridSpec(
            num_scalar_prefetch=0,
            grid=grid,
            in_specs=[
                pl.BlockSpec((tb, ts, D), lambda b, s: (b, s, 0)),   # streamed activations
                _resident_spec((D, D)),                              # w1 (VMEM-resident)
                _resident_spec((1, D)),                              # b1
                _resident_spec((D, P)),                              # w2
                _resident_spec((1, P)),                              # b2
            ],
            out_specs=(
                pl.BlockSpec((tb, D), lambda b, s: (b, 0)),
                pl.BlockSpec((tb, P), lambda b, s: (b, 0)),
            ),
            scratch_shapes=[pltpu.VMEM((tb, acc_rows, D), jnp.float32)],
        ),
        compiler_params=pltpu.CompilerParams(
            dimension_semantics=("parallel", "arbitrary"),   # batch across TCs, seq = reduction
            vmem_limit_bytes=vmem_limit,
        ),
    )(hidden_states, w1, b1, w2, b2)
    return pooled, proj


def reference_forward(hidden_states, w1, b1, w2, b2):
    hs = hidden_states.astype(jnp.float32)
    pooled = jnp.mean(hs, axis=1)
    h1 = jnp.maximum(pooled @ w1.astype(jnp.float32) + b1.astype(jnp.float32), 0.0)
    proj = h1 @ w2.astype(jnp.float32) + b2.astype(jnp.float32)
    return pooled, proj


if __name__ == "__main__":
    key = jax.random.PRNGKey(0)
    k_h, k_w1, k_b1, k_w2, k_b2, k_h2 = jax.random.split(key, 6)

    # Small stand-in shapes: embedding_dim 768 -> 32, projection_dim 512 -> 16.
    B, S, D, P = 2, 20, 32, 16
    hidden_states = jax.random.normal(k_h, (B, S, D), dtype=jnp.float32)
    w1 = 0.02 * jax.random.normal(k_w1, (D, D), dtype=jnp.float32)
    b1 = 0.01 * jax.random.normal(k_b1, (1, D), dtype=jnp.float32)
    w2 = 0.02 * jax.random.normal(k_w2, (D, P), dtype=jnp.float32)
    b2 = 0.01 * jax.random.normal(k_b2, (1, P), dtype=jnp.float32)

    # ---- Test 1: f32, multi-step ragged sequence reduction (S=20 not a multiple of ts=8,
    # handled by in-kernel masking + true-S divide; no wrapper-side pad). --------------
    pooled, proj = audio_embedding_forward(hidden_states, w1, b1, w2, b2, seq_tile=8)
    jax.block_until_ready((pooled, proj))
    pooled_ref, proj_ref = reference_forward(hidden_states, w1, b1, w2, b2)
    assert pooled.shape == (B, D) and proj.shape == (B, P)
    assert jnp.allclose(pooled, pooled_ref, atol=1e-5, rtol=1e-5)
    assert jnp.allclose(proj, proj_ref, atol=1e-5, rtol=1e-5)

    # ---- Test 2: bf16 stream + bf16 weights, batch split into two "parallel" tiles
    # (B=16 -> tb=8), default seq tile (16-row granule for bf16). -----------------------
    B2 = 16
    hs2 = jax.random.normal(k_h2, (B2, S, D), dtype=jnp.float32).astype(jnp.bfloat16)
    w1b, b1b, w2b, b2b = (a.astype(jnp.bfloat16) for a in (w1, b1, w2, b2))
    pooled_b, proj_b = audio_embedding_forward(hs2, w1b, b1b, w2b, b2b)
    jax.block_until_ready((pooled_b, proj_b))
    pooled_rb, proj_rb = reference_forward(hs2, w1b, b1b, w2b, b2b)
    assert pooled_b.shape == (B2, D) and proj_b.shape == (B2, P)
    assert pooled_b.dtype == jnp.bfloat16 and proj_b.dtype == jnp.bfloat16
    assert jnp.allclose(pooled_b.astype(jnp.float32), pooled_rb, atol=1e-2, rtol=5e-2)
    assert jnp.allclose(proj_b.astype(jnp.float32), proj_rb, atol=1e-2, rtol=5e-2)

    print("KERNEL_OK")
</pallas_src>

<mosaic_0001>
module attributes {stable_mosaic.version = 11 : i64} {
  func.func @pool_project_kernel(%arg0: i32, %arg1: i32, %arg2: memref<2x8x32xf32, #tpu.memory_space<vmem>>, %arg3: memref<32x32xf32, #tpu.memory_space<vmem>>, %arg4: memref<1x32xf32, #tpu.memory_space<vmem>>, %arg5: memref<32x16xf32, #tpu.memory_space<vmem>>, %arg6: memref<1x16xf32, #tpu.memory_space<vmem>>, %arg7: memref<2x32xf32, #tpu.memory_space<vmem>>, %arg8: memref<2x16xf32, #tpu.memory_space<vmem>>, %arg9: memref<2x8x32xf32, #tpu.memory_space<vmem>>) attributes {dimension_semantics = [#tpu.dimension_semantics<parallel>, #tpu.dimension_semantics<arbitrary>], iteration_bounds = array<i64: 1, 3>, scalar_prefetch = 0 : i64, scratch_operands = 1 : i64, tpu.core_type = #tpu.core_type<tc>, window_params = [{transform_indices = @transform_0, window_bounds = array<i64: 2, 8, 32>}, {pipeline_mode = #tpu.pipeline_mode<synchronous>, transform_indices = @transform_1, window_bounds = array<i64: 32, 32>}, {pipeline_mode = #tpu.pipeline_mode<synchronous>, transform_indices = @transform_2, window_bounds = array<i64: 1, 32>}, {pipeline_mode = #tpu.pipeline_mode<synchronous>, transform_indices = @transform_3, window_bounds = array<i64: 32, 16>}, {pipeline_mode = #tpu.pipeline_mode<synchronous>, transform_indices = @transform_4, window_bounds = array<i64: 1, 16>}, {transform_indices = @transform_5, window_bounds = array<i64: 2, 32>}, {transform_indices = @transform_6, window_bounds = array<i64: 2, 16>}]} {
    %c0_i32 = arith.constant 0 : i32
    %0 = arith.cmpi eq, %arg1, %c0_i32 : i32
    %1 = arith.extui %0 : i1 to i32
    %c0_i32_0 = arith.constant 0 : i32
    %2 = arith.cmpi ne, %1, %c0_i32_0 : i32
    scf.if %2 {
      %cst_10 = arith.constant 0.000000e+00 : f32
      %20 = vector.broadcast %cst_10 : f32 to vector<2x8x32xf32>
      %c0_11 = arith.constant 0 : index
      %c0_12 = arith.constant 0 : index
      %c0_13 = arith.constant 0 : index
      %21 = vector.load %arg9[%c0_11, %c0_12, %c0_13] : memref<2x8x32xf32, #tpu.memory_space<vmem>>, vector<2x8x32xf32>
      tpu.vector_store %arg9[%c0_11, %c0_12, %c0_13], %20 {strides = array<i32>} : memref<2x8x32xf32, #tpu.memory_space<vmem>>, vector<2x8x32xf32>,
    } else {
    }
    %c0 = arith.constant 0 : index
    %c0_1 = arith.constant 0 : index
    %c0_2 = arith.constant 0 : index
    %3 = vector.load %arg2[%c0, %c0_1, %c0_2] : memref<2x8x32xf32, #tpu.memory_space<vmem>>, vector<2x8x32xf32>
    %4 = tpu.iota {dimensions = array<i32: 0>} : vector<8x32xi32>
    %c8_i32 = arith.constant 8 : i32
    %5 = arith.muli %arg1, %c8_i32 : i32
    %c20_i32 = arith.constant 20 : i32
    %6 = arith.subi %c20_i32, %5 : i32
    %7 = vector.broadcast %6 : i32 to vector<8x32xi32>
    %8 = arith.cmpi slt, %4, %7 : vector<8x32xi32>
    %9 = vector.shape_cast %8 : vector<8x32xi1> to vector<1x8x32xi1>
    %cst = arith.constant 0.000000e+00 : f32
    %10 = vector.shape_cast %9 : vector<1x8x32xi1> to vector<1x8x32xi1>
    %11 = vector.broadcast %10 : vector<1x8x32xi1> to vector<2x8x32xi1>
    %12 = vector.broadcast %cst : f32 to vector<2x8x32xf32>
    %13 = arith.select %11, %3, %12 : vector<2x8x32xi1>, vector<2x8x32xf32>
    %c0_3 = arith.constant 0 : index
    %c0_4 = arith.constant 0 : index
    %c0_5 = arith.constant 0 : index
    %14 = vector.load %arg9[%c0_3, %c0_4, %c0_5] : memref<2x8x32xf32, #tpu.memory_space<vmem>>, vector<2x8x32xf32>
    %15 = arith.addf %14, %13 : vector<2x8x32xf32>
    %c0_6 = arith.constant 0 : index
    %c0_7 = arith.constant 0 : index
    %c0_8 = arith.constant 0 : index
    %16 = vector.load %arg9[%c0_6, %c0_7, %c0_8] : memref<2x8x32xf32, #tpu.memory_space<vmem>>, vector<2x8x32xf32>
    tpu.vector_store %arg9[%c0_6, %c0_7, %c0_8], %15 {strides = array<i32>} : memref<2x8x32xf32, #tpu.memory_space<vmem>>, vector<2x8x32xf32>,
    %c2_i32 = arith.constant 2 : i32
    %17 = arith.cmpi eq, %arg1, %c2_i32 : i32
    %18 = arith.extui %17 : i1 to i32
    %c0_i32_9 = arith.constant 0 : i32
    %19 = arith.cmpi ne, %18, %c0_i32_9 : i32
    scf.if %19 {
      %c0_10 = arith.constant 0 : index
      %c0_11 = arith.constant 0 : index
      %c0_12 = arith.constant 0 : index
      %20 = vector.load %arg9[%c0_10, %c0_11, %c0_12] : memref<2x8x32xf32, #tpu.memory_space<vmem>>, vector<2x8x32xf32>
      %cst_13 = arith.constant dense<0.000000e+00> : vector<2x32xf32>
      %21 = vector.multi_reduction <add>, %20, %cst_13 [1] : vector<2x8x32xf32> to vector<2x32xf32>
      %cst_14 = arith.constant 5.000000e-02 : f32
      %22 = vector.broadcast %cst_14 : f32 to vector<2x32xf32>
      %23 = arith.mulf %21, %22 : vector<2x32xf32>
      %c0_15 = arith.constant 0 : index
      %c0_16 = arith.constant 0 : index
      %24 = vector.load %arg7[%c0_15, %c0_16] : memref<2x32xf32, #tpu.memory_space<vmem>>, vector<2x32xf32>
      tpu.vector_store %arg7[%c0_15, %c0_16], %23 {strides = array<i32>} : memref<2x32xf32, #tpu.memory_space<vmem>>, vector<2x32xf32>,
      %c0_17 = arith.constant 0 : index
      %c0_18 = arith.constant 0 : index
      %25 = vector.load %arg3[%c0_17, %c0_18] : memref<32x32xf32, #tpu.memory_space<vmem>>, vector<32x32xf32>
      %cst_19 = arith.constant dense<0.000000e+00> : vector<2x32xf32>
      %26 = tpu.matmul %23, %25, %cst_19 {dimension_numbers = #tpu.dot_dimension_numbers<[1], [0], [0], [1], [0, 0, 1, 1], [], []>} : vector<2x32xf32>, vector<32x32xf32>, vector<2x32xf32> -> vector<2x32xf32>
      %c0_20 = arith.constant 0 : index
      %c0_21 = arith.constant 0 : index
      %27 = vector.load %arg4[%c0_20, %c0_21] : memref<1x32xf32, #tpu.memory_space<vmem>>, vector<1x32xf32>
      %28 = vector.broadcast %27 : vector<1x32xf32> to vector<2x32xf32>
      %29 = arith.addf %26, %28 : vector<2x32xf32>
      %cst_22 = arith.constant 0.000000e+00 : f32
      %30 = vector.broadcast %cst_22 : f32 to vector<2x32xf32>
      %31 = arith.maximumf %29, %30 : vector<2x32xf32>
      %c0_23 = arith.constant 0 : index
      %c0_24 = arith.constant 0 : index
      %32 = vector.load %arg5[%c0_23, %c0_24] : memref<32x16xf32, #tpu.memory_space<vmem>>, vector<32x16xf32>
      %cst_25 = arith.constant dense<0.000000e+00> : vector<2x16xf32>
      %33 = tpu.matmul %31, %32, %cst_25 {dimension_numbers = #tpu.dot_dimension_numbers<[1], [0], [0], [1], [0, 0, 1, 1], [], []>} : vector<2x32xf32>, vector<32x16xf32>, vector<2x16xf32> -> vector<2x16xf32>
      %c0_26 = arith.constant 0 : index
      %c0_27 = arith.constant 0 : index
      %34 = vector.load %arg6[%c0_26, %c0_27] : memref<1x16xf32, #tpu.memory_space<vmem>>, vector<1x16xf32>
      %35 = vector.broadcast %34 : vector<1x16xf32> to vector<2x16xf32>
      %36 = arith.addf %33, %35 : vector<2x16xf32>
      %c0_28 = arith.constant 0 : index
      %c0_29 = arith.constant 0 : index
      %37 = vector.load %arg8[%c0_28, %c0_29] : memref<2x16xf32, #tpu.memory_space<vmem>>, vector<2x16xf32>
      tpu.vector_store %arg8[%c0_28, %c0_29], %36 {strides = array<i32>} : memref<2x16xf32, #tpu.memory_space<vmem>>, vector<2x16xf32>,
    } else {
    }
    return
  }
  func.func @transform_0(%arg0: i32, %arg1: i32) -> (i32, i32, i32) {
    %c0_i32 = arith.constant 0 : i32
    %c0_i32_0 = arith.constant 0 : i32
    return %arg0, %arg1, %c0_i32 : i32, i32, i32
  }
  func.func @transform_1(%arg0: i32, %arg1: i32) -> (i32, i32) {
    %c0_i32 = arith.constant 0 : i32
    %c0_i32_0 = arith.constant 0 : i32
    %c0_i32_1 = arith.constant 0 : i32
    return %c0_i32, %c0_i32_0 : i32, i32
  }
  func.func @transform_2(%arg0: i32, %arg1: i32) -> (i32, i32) {
    %c0_i32 = arith.constant 0 : i32
    %c0_i32_0 = arith.constant 0 : i32
    %c0_i32_1 = arith.constant 0 : i32
    return %c0_i32, %c0_i32_0 : i32, i32
  }
  func.func @transform_3(%arg0: i32, %arg1: i32) -> (i32, i32) {
    %c0_i32 = arith.constant 0 : i32
    %c0_i32_0 = arith.constant 0 : i32
    %c0_i32_1 = arith.constant 0 : i32
    return %c0_i32, %c0_i32_0 : i32, i32
  }
  func.func @transform_4(%arg0: i32, %arg1: i32) -> (i32, i32) {
    %c0_i32 = arith.constant 0 : i32
    %c0_i32_0 = arith.constant 0 : i32
    %c0_i32_1 = arith.constant 0 : i32
    return %c0_i32, %c0_i32_0 : i32, i32
  }
  func.func @transform_5(%arg0: i32, %arg1: i32) -> (i32, i32) {
    %c0_i32 = arith.constant 0 : i32
    %c0_i32_0 = arith.constant 0 : i32
    return %arg0, %c0_i32 : i32, i32
  }
  func.func @transform_6(%arg0: i32, %arg1: i32) -> (i32, i32) {
    %c0_i32 = arith.constant 0 : i32
    %c0_i32_0 = arith.constant 0 : i32
    return %arg0, %c0_i32 : i32, i32
  }
}

</mosaic_0001>

<bundles_post_ra>
// kernel: tpu_custom_call.1
= control target key start
LH: loop header
LB: loop body
LE: loop exit
PB: predicated region body
PF: predicated region fallthrough
CT: control target
= control target key end

     0   :  { %12 = vsyncpa [#allocation5], 0  ;;  %s1042_s0 = inlined_call_operand.vmem [shape: f32[2,20,32], index: 0, kind: input, shape index: {}]   ;;  %s1043_s1 = inlined_call_operand.vmem [shape: f32[32,32], index: 1, kind: input, shape index: {}]   ;;  %s1044_s2 = inlined_call_operand.vmem [shape: f32[1,32], index: 2, kind: input, shape index: {}]   ;;  %s1045_s3 = inlined_call_operand.vmem [shape: f32[32,16], index: 3, kind: input, shape index: {}]   ;;  %s1046_s4 = inlined_call_operand.vmem [shape: f32[1,16], index: 4, kind: input, shape index: {}]   ;;  %s1047_s5 = inlined_call_operand.hbm [shape: f32[2,32], index: 5, kind: output, shape index: {0}]   ;;  %s1048_s6 = inlined_call_operand.hbm [shape: f32[2,16], index: 6, kind: output, shape index: {1}]  }
   0x1   :  { %13 = vsyncpa [#allocation7], 0  ;;  %s884_s21 = smov 0   ;;  %s886_s22 = smov 0  }
   0x2   :  { %s888_s23 = smov 0   ;;  %s890_s24 = smov 0  }
   0x3   :  { %s892_s25 = smov 0  }
   0x4 LB: > { %s621_s26 = sadd.s32 4294967295, %s841_s25   ;;  %s28_s27 = sadd.s32 1, %s837_s24  ;;  %s841_s25 = sphi %s892_s25, %s19_s25   ;;  %s837_s24 = sphi %s890_s24, %s1053_s24   ;;  %s833_s23 = sphi %s888_s23, %s1052_s23   ;;  %s829_s22 = sphi %s886_s22, %s1051_s22   ;;  %s825_s21 = sphi %s884_s21, %s1050_s21  }
   0x5   : > { %p29_p0 = scmp.ge.s32.totalorder %s28_s27, 3  ;;  %p47_p1 = scmp.ne.s32.totalorder %s829_s22, %s825_s21 }
   0x6   : > { %p48_p2 = scmp.eq.s32.totalorder %s841_s25, 0  ;;  %s40_s29 = sadd.s32 1, %s829_s22 }
   0x7   : > { %s1055_s27 = smov (%p29_p0, %s28_s27), 0  ;;  %p623_p5 = scmp.ge.s32.totalorder %s841_s25, 3 }
   0x8   : > { %p49_p3 = por %p48_p2, %p47_p1  ;;  %s36_s28 = ssub.s32 %s837_s24, %s1055_s27 }
   0x9   : > { %p38_p4 = scmp.eq.s32.totalorder %s36_s28, 0  ;;  %221 = sbr.rel (%p623_p5) target bundleno = 23 (0x17), region = 32 }
   0xb   : > { %s920_s30 = scalar_select %p38_p4, %s829_s22, %s40_s29  }
  0x10   : > { %224 = sbr.rel (!%p49_p3) target bundleno = 23 (0x17), region = 36  ;;  %s226_s7 = sand.u32 (%p49_p3), 1, %s829_s22  }
  0x11   : > { %s625_s8 = sshll.u32 (%p49_p3), %s837_s24, 3  ;;  %s624_s9 = sshll.u32 (%p49_p3), %s226_s7, 4 }
  0x12   : > { %s233_s12 = scalar_lea.vmem (%p49_p3), %s1042_s0, %s625_s8  ;;  %s228_s13 = scalar_lea.vmem (%p49_p3), [#allocation3], %s624_s9 }
  0x13   : > { %v263_v0 = vld [vmem:[%s233_s12] sm:$0xff] (%p49_p3)  ;;  %v265_v1 = vld [vmem:[%s233_s12 + $0x18] sm:$0xff] (%p49_p3) }
  0x14   : > { %264 = vst [vmem:[%s228_s13] sm:$0xff] (%p49_p3), %v263_v0  ;;  %266 = vst [vmem:[%s228_s13 + $0x8] sm:$0xff] (%p49_p3), %v265_v1 }
  0x17 PF: > { %p626_p6 = scmp.ge.s32.totalorder %s841_s25, 1  ;;  %p271_p7 = scmp.lt.s32.totalorder %s841_s25, 4 }
  0x19   : > { %p272_p8 = pnand %p626_p6, %p271_p7 }
  0x1a   : > { %s278_s14 = sand.u32 (!%p272_p8), 1, %s825_s21   ;;  %p628_p9 = scmp.ne.s32.totalorder (!%p272_p8), %s833_s23, 0 }
  0x1b   : > { %275 = sbr.rel (%p272_p8) target bundleno = 552 (0x228), region = 74  ;;  %s627_s15 = sshll.u32 (!%p272_p8), %s278_s14, 4 }
  0x1c   : > { %s280_s16 = scalar_lea.vmem (!%p272_p8), [#allocation3], %s627_s15 }
  0x22   : > { %306 = sbr.rel (%p628_p9) target bundleno = 41 (0x29), region = 82  ;;  %vm307_vm0 = vcmask (!%p628_p9), 261120   ;;  %v843_v2 = vmov (!%p628_p9), 0.0  }
  0x23   : > { %308 = vst.msk [vmem:[#allocation2] sm:$0xff] (!%p628_p9), %vm307_vm0, %v843_v2  ;;  %309 = vst.msk [vmem:[#allocation2 + $0x8] sm:$0xff] (!%p628_p9), %vm307_vm0, %v843_v2 }
  0x29 PF: > { %v312_v3 = vlaneseq  ;;  %s629_s17 = sshll.u32 %s833_s23, 3  ;;  %v310_v4 = vld [vmem:[%s280_s16] sm:$0xff]  ;;  %v311_v7 = vld [vmem:[%s280_s16 + $0x8] sm:$0xff]  ;;  %vm326_vm2 = vcmask 261120   ;;  %p630_p10 = scmp.ne.s32.totalorder %s833_s23, 2 }
  0x2a   : > { %s315_s18 = ssub.s32 20, %s629_s17  ;;  %v322_v8 = vld [vmem:[#allocation2] sm:$0xff]  ;;  %v323_v9 = vld [vmem:[#allocation2 + $0x8] sm:$0xff]  ;;  %v360_v16 = vld [vmem:[%s1043_s1 + $0x10] sm:$0xff] (!%p630_p10)  ;;  %v844_v17 = vmov (!%p630_p10), 0.0|0.0   ;;  %vm845_vm3 = vmmov (!%p630_p10), 0  }
  0x2b   : > { %v313_v5 = vshrl.u32 %v312_v3, 7  ;;  %v316_v6 = vstv %s315_s18  ;;  %332 = sbr.rel (%p630_p10) target bundleno = 504 (0x1f8), region = 86  ;;  %v358_v14 = vld [vmem:[%s1043_s1] sm:$0xff] (!%p630_p10)  ;;  %v359_v15 = vld [vmem:[%s1043_s1 + $0x8] sm:$0xff] (!%p630_p10)  ;;  %673 = vmatprep.subr.bf16.mxu0 (!%p630_p10), %v844_v17  ;;  %v361_v19 = vld [vmem:[%s1043_s1 + $0x18] sm:$0xff] (!%p630_p10)  ;;  %v846_v20 = vmov (!%p630_p10), 0.0   ;;  %679 = vmatprep.subr.bf16.mxu1 (!%p630_p10), %v844_v17 }
  0x2c   : > { %v674_v18 = vpack.c.bf16 (!%p630_p10), %v359_v15, %v358_v14  ;;  %659 = vmatprep.mubr.msk.f32.mxu0 (!%p630_p10), %vm845_vm3, %v846_v20  ;;  %v442_v25 = vld [vmem:[%s1045_s3] sm:$0xff] (!%p630_p10)  ;;  %v443_v26 = vld [vmem:[%s1045_s3 + $0x8] sm:$0xff] (!%p630_p10)  ;;  %670 = vmatprep.mubr.msk.f32.mxu1 (!%p630_p10), %vm845_vm3, %v846_v20  ;;  %v677_v27 = vpack.c.bf16 (!%p630_p10), %v361_v19, %v360_v16  ;;  %vm353_vm4 = vcmask (!%p630_p10), 1041409   ;;  %vm356_vm5 = vcmask (!%p630_p10), 254976   ;;  %v444_v44 = vld [vmem:[%s1045_s3 + $0x10] sm:$0xff] (!%p630_p10) }
  0x2d   : > { %vm317_vm1 = vcmp.lt.s32.totalorder %v313_v5, %v316_v6  ;;  %v680_v30 = vpack.c.bf16 (!%p630_p10), %v443_v26, %v442_v25  ;;  %v445_v45 = vld [vmem:[%s1045_s3 + $0x18] sm:$0xff] (!%p630_p10)  ;;  %v631_v47 = vld [vmem:[%s1044_s2] ss:$0 sm:$0xff] (!%p630_p10)  ;;  %vm526_vm6 = vcmask (!%p630_p10), 123904  }
  0x2e   : > { %v320_v10 = vsel %vm317_vm1, %v310_v4, 0.0  ;;  %v321_v11 = vsel %vm317_vm1, %v311_v7, 0.0  ;;  %675 = vmatpush3.bf16.msra.mxu0 (!%p630_p10), %v674_v18  ;;  %v683_v46 = vpack.c.bf16 (!%p630_p10), %v445_v45, %v444_v44  ;;  %v633_v52 = vld [vmem:[%s1046_s4] ss:$0 sm:$0xff] (!%p630_p10) }
  0x2f   : > { %v324_v12 = vadd.f32 %v322_v8, %v320_v10  ;;  %v325_v13 = vadd.f32 %v323_v9, %v321_v11  ;;  %676 = vmatprep.subr.bf16.mxu0 (!%p630_p10), %v844_v17  ;;  %681 = vmatpush3.bf16.msra.mxu1 (!%p630_p10), %v680_v30 }
  0x30   : > { %682 = vmatprep.subr.bf16.mxu1 (!%p630_p10), %v844_v17 }
  0x31   : > { %327 = vst.msk [vmem:[#allocation2] sm:$0xff] %vm326_vm2, %v324_v12  ;;  %328 = vst.msk [vmem:[#allocation2 + $0x8] sm:$0xff] %vm326_vm2, %v325_v13 }
  0x32   : > { %678 = vmatpush3.bf16.msra.mxu0 %v677_v27 }
  0x33   : > { %684 = vmatpush3.bf16.msra.mxu1 %v683_v46 }
  0x38   : > { %v333_v21 = vld [vmem:[#allocation2] sm:$0xff]  ;;  %v334_v22 = vld [vmem:[#allocation2 + $0x8] sm:$0xff] }
  0x39   : > { %v335_v23 = vsel %vm326_vm2, %v333_v21, 0.0  ;;  %v342_v24 = vsel %vm326_vm2, %v334_v22, 0.0 }
  0x3a   : > { %v336_v28 = vrot.slane %v335_v23, 4  ;;  %v343_v29 = vrot.slane %v342_v24, 4 }
  0x3c   : > { %v337_v31 = vadd.f32 %v336_v28, %v335_v23  ;;  %v344_v32 = vadd.f32 %v343_v29, %v342_v24 }
  0x3e   : > { %v338_v33 = vrot.slane %v337_v31, 2  ;;  %v345_v34 = vrot.slane %v344_v32, 2 }
  0x40   : > { %v339_v35 = vadd.f32 %v338_v33, %v337_v31  ;;  %v346_v36 = vadd.f32 %v345_v34, %v344_v32 }
  0x42   : > { %v340_v37 = vrot.slane %v339_v35, 1  ;;  %v347_v38 = vrot.slane %v346_v36, 1 }
  0x44   : > { %v341_v39 = vadd.f32 %v340_v37, %v339_v35  ;;  %v348_v40 = vadd.f32 %v347_v38, %v346_v36 }
  0x46   : > { %v349_v41 = vmul.f32 0.05, %v341_v39  ;;  %v350_v42 = vmul.f32 0.05, %v348_v40 }
  0x48   : > { %v354_v43 = vsel %vm353_vm4, %v350_v42, %v349_v41 }
  0x49   : > { %357 = vst.msk [vmem:[#allocation4] sm:$0x3] %vm356_vm5, %v354_v43  ;;  %660 = vmatmul.mubr.msk.f32.vlgmr.msra.gmra.mrb[0].mxu0 %vm326_vm2, %v354_v43 }
 0x11c   : > { %v437_v48 = vpop.f32.mrb[0].mxu0 }
 0x11d   : > { %v438_v49 = vadd.f32 %v631_v47, %v437_v48  ;;  %v661_v50 = vpop.f32.mrb[1].mxu0 }
 0x11f   : > { %v441_v51 = vmax.f32 %v438_v49, 0.0 }
 0x121   : > { %671 = vmatmul.mubr.msk.f32.vlgmr.msra.gmra.mrb[0].mxu1 %vm326_vm2, %v441_v51 }
 0x1f4   : > { %v522_v53 = vpop.f32.mrb[0].mxu1 }
 0x1f5   : > { %v523_v54 = vadd.f32 %v633_v52, %v522_v53  ;;  %v672_v55 = vpop.f32.mrb[1].mxu1 }
 0x1f7   : > { %527 = vst.msk [vmem:[#allocation6] sm:$0x3] %vm526_vm6, %v523_v54 }
 0x1f8 PF: > { %p972_p11 = scmp.eq.s32.totalorder %s621_s26, 2  ;;  %s847_s28 = smov [#allocation4]  }
 0x1f9   : > { %s537_s29 = sshll.u32 %s847_s28, 4  ;;  %s848_s7 = smov [#allocation6]   ;;  %s538_s29 = int_to_ptr.vmem [resolvable:$true] %s537_s29 }
 0x1fa   : > { %s550_s8 = sshll.u32 %s848_s7, 4  ;;  %s743_s9 = scalar_lea.vmem %s538_s29, 32  ;;  %s976_s8 = int_to_ptr.vmem [resolvable:$true] %s550_s8 }
 0x1fb   : > { %p744_p12 = scmp.ne.s32.totalorder %s538_s29, %s743_s9  ;;  %p750_p1 = scmp.lt.s32.totalorder %s538_s29, %s538_s29 }
 0x1fc   : > { %p751_p2 = scmp.lt.s32.totalorder %s743_s9, %s743_s9 }
 0x1fd   : > { %p745_p13 = pnand %p744_p12, %p972_p11 }
 0x1fe   : > { %p752_p3 = por %p751_p2, %p750_p1 }
 0x1ff   : > { %p746_p0 = pneg %p745_p13 }
 0x201   : > { %p753_p4 = pnand %p752_p3, %p746_p0 }
 0x203   : > { %756 = shalt.err (!%p753_p4)
}
 0x204   : > { %s757_s10 = scalar_lea.hbm %s1047_s5, 32 }
 0x205   : > { %p758_p5 = scmp.ne.s32.totalorder %s1047_s5, %s757_s10  ;;  %p763_p8 = scmp.lt.u32.totalorder %s757_s10, %s1047_s5 }
 0x207   : > { %p759_p6 = pnand %p758_p5, %p972_p11 }
 0x209   : > { %p760_p7 = pneg %p759_p6 }
 0x20b   : > { %p765_p9 = pnand %p763_p8, %p760_p7 }
 0x20d   : > { %768 = shalt.err (!%p765_p9)
}
 0x20e   : > { %686 = dma.vmem_to_hbm [thread:$0]  (%p972_p11), %s538_s29, 32, %s1047_s5, [#allocation5]  }
 0x20f   : > { %s769_s17 = scalar_lea.vmem %s976_s8, 32  ;;  %p776_p0 = scmp.lt.s32.totalorder %s976_s8, %s976_s8 }
 0x210   : > { %p770_p10 = scmp.ne.s32.totalorder %s976_s8, %s769_s17  ;;  %p777_p1 = scmp.lt.s32.totalorder %s769_s17, %s769_s17 }
 0x212   : > { %p771_p12 = pnand %p770_p10, %p972_p11  ;;  %p778_p2 = por %p777_p1, %p776_p0 }
 0x214   : > { %p772_p13 = pneg %p771_p12 }
 0x216   : > { %p779_p3 = pnand %p778_p2, %p772_p13 }
 0x218   : > { %782 = shalt.err (!%p779_p3)
}
 0x219   : > { %s783_s20 = scalar_lea.hbm %s1048_s6, 32 }
 0x21a   : > { %p784_p4 = scmp.ne.s32.totalorder %s1048_s6, %s783_s20  ;;  %p789_p7 = scmp.lt.u32.totalorder %s783_s20, %s1048_s6 }
 0x21c   : > { %p785_p5 = pnand %p784_p4, %p972_p11 }
 0x21e   : > { %p786_p6 = pneg %p785_p5 }
 0x220   : > { %p791_p8 = pnand %p789_p7, %p786_p6 }
 0x222   : > { %794 = shalt.err (!%p791_p8)
}
 0x223   : > { %688 = dma.vmem_to_hbm [thread:$0]  (%p972_p11), %s976_s8, 32, %s1048_s6, [#allocation7]  }
 0x224   : > { %816 = dma.done.wait (%p972_p11), [#allocation5], 32  }
 0x225   : > { %818 = vsyncadd (%p972_p11), [#allocation5], 4294967264 }
 0x226   : > { %820 = dma.done.wait (%p972_p11), [#allocation7], 32  }
 0x227   : > { %822 = vsyncadd (%p972_p11), [#allocation7], 4294967264 }
 0x228 PF: > { %s19_s25 = sadd.s32 1, %s841_s25   ;;  %s1050_s21 = smov %s829_s22 }
 0x229   : > { %p16_p9 = scmp.ge.s32.totalorder %s19_s25, 5   ;;  %s1051_s22 = smov %s920_s30 }
 0x22a   : > { %s1052_s23 = smov %s837_s24  ;;  %s1053_s24 = smov %s1055_s27 }
 0x22b   :  { %18 = sbr.rel (!%p16_p9) target bundleno = 4 (0x4), region = 128 }
 0x232   :  { %567 = vsyncpa [#allocation5], 1 }
 0x233   :  { %569 = vsyncpa [#allocation5 + $0x1], 1 }
 0x234   :  { %570 = vsyncpa [#allocation7], 1 }

</bundles_post_ra>
